<compile_context>
chip_gen: v7x
topology: tpu7x:2x2x1
jax: 0.10.0
libtpu: 0.0.40
codegen_flags: <defaults>
</compile_context>

<pallas_src>
import functools

import jax
import jax.numpy as jnp
from jax.experimental import pallas as pl
from jax.experimental.pallas import tpu as pltpu

_LANE = 128
_BLOCK_BUDGET = 6 * 1024 * 1024      # ~6 MiB of (input + output) per grid step
_VMEM_CAP = 64 * 1024 * 1024         # stay inside v7x physical VMEM


def _maxpool_kernel(x_ref, o_ref, *, kh, kw, sh, sw, h_out, w_out):
    """Pool one (H, W, TILE_NC) block into (h_out, w_out, TILE_NC).

    NC sits on the lane axis, W on sublanes and H on the leading axis, so the
    kh step is a (strided) leading-axis ref read and the kw step a sublane
    slice -- no lane work, and the output store is lane-dense whenever
    TILE_NC is a multiple of 128.
    """
    w_in = x_ref.shape[1]
    nct = x_ref.shape[2]
    w_span = (w_out - 1) * sw + 1

    # Step 1: reduce the kh window offsets along H, reading strided row-sets
    # directly from the pipelined VMEM block (no full-tile materialization).
    acc = None
    for i in range(kh):
        if sh == 1:
            rows = x_ref[pl.ds(i, h_out), :, :]
        else:
            rows = x_ref[pl.ds(i, h_out, stride=sh), :, :]
        acc = rows if acc is None else jnp.maximum(acc, rows)

    # Step 2: reduce the kw window offsets along W (sublane axis) on the
    # already-reduced (h_out, W, TILE_NC) value.
    out = None
    for j in range(kw):
        sl = jax.lax.slice(acc, (0, j, 0), (h_out, j + w_span, nct), (1, sw, 1))
        out = sl if out is None else jnp.maximum(out, sl)

    o_ref[...] = out.astype(o_ref.dtype)


def _choose_nc_tiling(nc, h, w, h_out, w_out, in_itemsize):
    """Return (nc_pad, tile_nc) with tile_nc | nc_pad.

    * nc < 128: no padding at all (block dims equal to the full array dims are
      always legal); a single grid step.
    * otherwise: pad NC only up to the next multiple of 128 and pick the
      largest 128-multiple divisor of nc_pad whose (input + output) block fits
      the budget; cap at nc_pad/2 when possible so the grid keeps >= 2 steps
      for v7x's two TensorCores.
    """
    if nc < _LANE:
        return nc, nc

    nc_pad = pl.cdiv(nc, _LANE) * _LANE
    m = nc_pad // _LANE
    unit = (h * w * in_itemsize + h_out * w_out * 4) * _LANE  # bytes / 128 lanes
    max_d = m if m == 1 else m // 2
    best = 1
    for d in range(1, max_d + 1):
        if m % d == 0 and d * unit <= _BLOCK_BUDGET:
            best = d
    return nc_pad, _LANE * best


def maxpool2d(x, kernel_size, padding=0, stride=1):
    """Matches MaxPool2d.forward: float32 output (torch.zeros default dtype)."""
    if isinstance(kernel_size, int):
        kernel_size = (kernel_size, kernel_size)
    if isinstance(stride, int):
        stride = (stride, stride)
    if isinstance(padding, int):
        padding = (padding, padding)
    kh, kw = kernel_size
    sh, sw = stride
    ph, pw = padding

    # The reference module uses `padding` only in its output-shape formula
    # while slicing windows from the *unpadded* input, so the op is only well
    # defined for padding == 0; we require that here.
    if (ph, pw) != (0, 0):
        raise NotImplementedError("maxpool2d: only padding=0 matches the reference module")

    n, c, h, w = x.shape
    if h < kh or w < kw:
        raise ValueError(f"maxpool2d: input ({h},{w}) smaller than kernel ({kh},{kw})")
    h_out = (h - kh) // sh + 1
    w_out = (w - kw) // sw + 1
    nc = n * c
    in_itemsize = jnp.dtype(x.dtype).itemsize

    nc_pad, tile_nc = _choose_nc_tiling(nc, h, w, h_out, w_out, in_itemsize)

    # VMEM accounting: double-buffered input/output blocks + live temporaries
    # (acc slab + one row-set in the kh loop, plus the step-2 result).
    in_block = h * w * tile_nc * in_itemsize
    out_block = h_out * w_out * tile_nc * 4
    temporaries = 3 * h_out * w * tile_nc * 4
    need = 2 * (in_block + out_block) + temporaries
    if need > 60 * 1024 * 1024:
        # TODO(synk): very large single images need H tiling (output-row grid
        # axis with a (kh - sh)-row halo on the input block); not needed for
        # the activation shapes this module is used with.
        raise NotImplementedError("maxpool2d: image too large for VMEM; needs H tiling")
    vmem_limit = int(min(max(need + (4 << 20), 16 << 20), _VMEM_CAP))

    # (N, C, H, W) -> (H, W, NC); pad NC only up to a multiple of 128 and only
    # when actually required (never for nc < 128 or nc % 128 == 0).
    # TODO(synk): fold this transpose (and the output one) into the kernel by
    # reading (tile_nc, h, w) blocks and transposing on the idle XLU, or keep
    # the surrounding model channels-last; that removes the remaining extra
    # HBM round trips of this HBM-bound op.
    x3 = jnp.transpose(x.reshape(nc, h, w), (1, 2, 0))
    if nc_pad != nc:
        x3 = jnp.pad(x3, ((0, 0), (0, 0), (0, nc_pad - nc)))

    kernel = functools.partial(
        _maxpool_kernel, kh=kh, kw=kw, sh=sh, sw=sw, h_out=h_out, w_out=w_out
    )
    cost = pl.CostEstimate(
        flops=int((kh - 1) * h_out * w * nc_pad + (kw - 1) * h_out * w_out * nc_pad),
        transcendentals=0,
        bytes_accessed=int(h * w * nc_pad * in_itemsize + h_out * w_out * nc_pad * 4),
    )
    # Note: if profiling ever shows exposed input DMA, pipeline_mode=pl.Buffered(3)
    # on the input BlockSpec is the next cheap knob (account for it in vmem_limit).
    y3 = pl.pallas_call(
        kernel,
        out_shape=jax.ShapeDtypeStruct((h_out, w_out, nc_pad), jnp.float32),
        grid=(nc_pad // tile_nc,),
        in_specs=[pl.BlockSpec((h, w, tile_nc), lambda i: (0, 0, i))],
        out_specs=pl.BlockSpec((h_out, w_out, tile_nc), lambda i: (0, 0, i)),
        compiler_params=pltpu.CompilerParams(
            dimension_semantics=("parallel",),
            vmem_limit_bytes=vmem_limit,
        ),
        cost_estimate=cost,
    )(x3)

    # (H_out, W_out, NC_pad) -> (N, C, H_out, W_out); drop any NC padding.
    return jnp.transpose(y3[:, :, :nc], (2, 0, 1)).reshape(n, c, h_out, w_out)


def _ref_maxpool(x, kernel_size, stride):
    kh, kw = kernel_size
    sh, sw = stride
    return jax.lax.reduce_window(
        x.astype(jnp.float32),
        -jnp.inf,
        jax.lax.max,
        window_dimensions=(1, 1, kh, kw),
        window_strides=(1, 1, sh, sw),
        padding="VALID",
    )


if __name__ == "__main__":
    key = jax.random.PRNGKey(0)
    x_small = jax.random.normal(key, (2, 4, 16, 16), dtype=jnp.float32)    # nc=8  (no-pad path)
    x_wide = jax.random.normal(key, (2, 128, 16, 16), dtype=jnp.float32)   # nc=256 (grid=2 path)

    cases = [
        (x_small, (2, 2), (1, 1)),   # the module's default stride=1 path
        (x_small, (2, 2), (2, 2)),   # classic non-overlapping 2x2 / stride-2 pool
        (x_small, (3, 3), (2, 2)),   # overlapping, strided pool
        (x_wide, (2, 2), (2, 2)),    # NC multiple of 128 -> multi-block, lane-dense stores
    ]
    for xin, ks, st in cases:
        y = jax.block_until_ready(maxpool2d(xin, kernel_size=ks, padding=0, stride=st))
        ref = _ref_maxpool(xin, ks, st)
        assert y.shape == ref.shape, (y.shape, ref.shape)
        assert y.dtype == jnp.float32
        assert jnp.allclose(y, ref), f"mismatch vs reference for k={ks} s={st}"

    print("KERNEL_OK")
</pallas_src>

<mosaic_0001>
module attributes {stable_mosaic.version = 11 : i64} {
  func.func @_maxpool_kernel(%arg0: i32, %arg1: memref<16x16x8xf32, #tpu.memory_space<vmem>>, %arg2: memref<15x15x8xf32, #tpu.memory_space<vmem>>) attributes {dimension_semantics = [#tpu.dimension_semantics<parallel>], iteration_bounds = array<i64: 1>, scalar_prefetch = 0 : i64, scratch_operands = 0 : i64, tpu.core_type = #tpu.core_type<tc>, window_params = [{transform_indices = @transform_0, window_bounds = array<i64: 16, 16, 8>}, {transform_indices = @transform_1, window_bounds = array<i64: 15, 15, 8>}]} {
    %c0 = arith.constant 0 : index
    %c0_0 = arith.constant 0 : index
    %c0_1 = arith.constant 0 : index
    %0 = vector.load %arg1[%c0, %c0_0, %c0_1] : memref<16x16x8xf32, #tpu.memory_space<vmem>>, vector<15x16x8xf32>
    %c1 = arith.constant 1 : index
    %c0_2 = arith.constant 0 : index
    %c0_3 = arith.constant 0 : index
    %1 = vector.load %arg1[%c1, %c0_2, %c0_3] : memref<16x16x8xf32, #tpu.memory_space<vmem>>, vector<15x16x8xf32>
    %2 = arith.maximumf %0, %1 : vector<15x16x8xf32>
    %3 = vector.extract_strided_slice %2 {offsets = [0, 0, 0], sizes = [15, 15, 8], strides = [1, 1, 1]} : vector<15x16x8xf32> to vector<15x15x8xf32>
    %4 = vector.extract_strided_slice %2 {offsets = [0, 1, 0], sizes = [15, 15, 8], strides = [1, 1, 1]} : vector<15x16x8xf32> to vector<15x15x8xf32>
    %5 = arith.maximumf %3, %4 : vector<15x15x8xf32>
    %c0_4 = arith.constant 0 : index
    %c0_5 = arith.constant 0 : index
    %c0_6 = arith.constant 0 : index
    %6 = vector.load %arg2[%c0_4, %c0_5, %c0_6] : memref<15x15x8xf32, #tpu.memory_space<vmem>>, vector<15x15x8xf32>
    tpu.vector_store %arg2[%c0_4, %c0_5, %c0_6], %5 {strides = array<i32>} : memref<15x15x8xf32, #tpu.memory_space<vmem>>, vector<15x15x8xf32>,
    return
  }
  func.func @transform_0(%arg0: i32) -> (i32, i32, i32) {
    %c0_i32 = arith.constant 0 : i32
    %c0_i32_0 = arith.constant 0 : i32
    %c0_i32_1 = arith.constant 0 : i32
    return %c0_i32, %c0_i32_0, %arg0 : i32, i32, i32
  }
  func.func @transform_1(%arg0: i32) -> (i32, i32, i32) {
    %c0_i32 = arith.constant 0 : i32
    %c0_i32_0 = arith.constant 0 : i32
    %c0_i32_1 = arith.constant 0 : i32
    return %c0_i32, %c0_i32_0, %arg0 : i32, i32, i32
  }
}

</mosaic_0001>

<bundles_post_ra>
// kernel: tpu_custom_call.1
= control target key start
LH: loop header
LB: loop body
LE: loop exit
PB: predicated region body
PF: predicated region fallthrough
CT: control target
= control target key end

     0   :  { %vm129_vm0 = vcmask 1046528   ;;  %vm235_vm1 = vcmask 64512   ;;  %vm237_vm2 = vcmask 63488   ;;  %s542_s0 = inlined_call_operand.vmem [shape: f32[16,16,8], index: 0, kind: input, shape index: {}]   ;;  %s543_s1 = inlined_call_operand.vmem [shape: f32[15,15,8], index: 1, kind: output, shape index: {}]  }
   0x1   :  { %v8_v0 = vld [vmem:[%s542_s0] sm:$0xff]  ;;  %v9_v1 = vld [vmem:[%s542_s0 + $0x8] sm:$0xff]  ;;  %v271_v2 = vld [vmem:[%s542_s0 + $0x10] sm:$0xff] }
   0x2   :  { %v272_v3 = vld [vmem:[%s542_s0 + $0x18] sm:$0xff]  ;;  %v69_v4 = vmax.f32 %v8_v0, %v271_v2  ;;  %v273_v5 = vld [vmem:[%s542_s0 + $0x20] sm:$0xff]  ;;  %v274_v6 = vld [vmem:[%s542_s0 + $0x28] sm:$0xff] }
   0x3   :  { %v70_v7 = vmax.f32 %v9_v1, %v272_v3  ;;  %v71_v8 = vmax.f32 %v271_v2, %v273_v5  ;;  %v72_v9 = vmax.f32 %v272_v3, %v274_v6  ;;  %v275_v10 = vld [vmem:[%s542_s0 + $0x30] sm:$0xff]  ;;  %v276_v11 = vld [vmem:[%s542_s0 + $0x38] sm:$0xff]  ;;  %v277_v12 = vld [vmem:[%s542_s0 + $0x40] sm:$0xff] }
   0x4   :  { %v130_v13 = vrot.slane %v69_v4, 1  ;;  %v73_v14 = vmax.f32 %v273_v5, %v275_v10  ;;  %v74_v15 = vmax.f32 %v274_v6, %v276_v11  ;;  %v278_v16 = vld [vmem:[%s542_s0 + $0x48] sm:$0xff]  ;;  %v75_v17 = vmax.f32 %v275_v10, %v277_v12  ;;  %v279_v18 = vld [vmem:[%s542_s0 + $0x50] sm:$0xff]  ;;  %v280_v26 = vld [vmem:[%s542_s0 + $0x58] sm:$0xff] }
   0x5   :  { %v131_v19 = vrot.slane %v70_v7, 1  ;;  %v133_v20 = vrot.slane %v71_v8, 1  ;;  %v134_v21 = vrot.slane %v72_v9, 1  ;;  %v76_v22 = vmax.f32 %v276_v11, %v278_v16  ;;  %v281_v28 = vld [vmem:[%s542_s0 + $0x60] sm:$0xff]  ;;  %v282_v33 = vld [vmem:[%s542_s0 + $0x68] sm:$0xff]  ;;  %v283_v34 = vld [vmem:[%s542_s0 + $0x70] sm:$0xff] }
   0x6   :  { %v136_v23 = vrot.slane %v73_v14, 1  ;;  %v137_v24 = vrot.slane %v74_v15, 1  ;;  %v139_v25 = vrot.slane %v75_v17, 1  ;;  %v77_v27 = vmax.f32 %v277_v12, %v279_v18  ;;  %v284_v35 = vld [vmem:[%s542_s0 + $0x78] sm:$0xff]  ;;  %v285_v40 = vld [vmem:[%s542_s0 + $0x80] sm:$0xff]  ;;  %v286_v49 = vld [vmem:[%s542_s0 + $0x88] sm:$0xff] }
   0x7   :  { %v132_v29 = vsel %vm129_vm0, %v130_v13, %v131_v19  ;;  %v206_v30 = vmax.f32 %v70_v7, %v131_v19  ;;  %v135_v31 = vsel %vm129_vm0, %v133_v20, %v134_v21  ;;  %v208_v32 = vmax.f32 %v72_v9, %v134_v21  ;;  %v287_v62 = vld [vmem:[%s542_s0 + $0x90] sm:$0xff]  ;;  %v288_v63 = vld [vmem:[%s542_s0 + $0x98] sm:$0xff]  ;;  %v289_v0 = vld [vmem:[%s542_s0 + $0xa0] sm:$0xff] }
   0x8   :  { %v205_v36 = vmax.f32 %v69_v4, %v132_v29  ;;  %v207_v37 = vmax.f32 %v71_v8, %v135_v31  ;;  %v138_v38 = vsel %vm129_vm0, %v136_v23, %v137_v24  ;;  %v210_v39 = vmax.f32 %v74_v15, %v137_v24  ;;  %v290_v5 = vld [vmem:[%s542_s0 + $0xa8] sm:$0xff]  ;;  %v291_v6 = vld [vmem:[%s542_s0 + $0xb0] sm:$0xff]  ;;  %v292_v15 = vld [vmem:[%s542_s0 + $0xb8] sm:$0xff] }
   0x9   :  { %238 = vst.msk [vmem:[%s543_s1 + $0x8] sm:$0x7f] %vm237_vm2, %v206_v30  ;;  %240 = vst.msk [vmem:[%s543_s1 + $0x18] sm:$0x7f] %vm237_vm2, %v208_v32  ;;  %v209_v41 = vmax.f32 %v73_v14, %v138_v38  ;;  %v140_v42 = vrot.slane %v76_v22, 1  ;;  %v78_v43 = vmax.f32 %v278_v16, %v280_v26  ;;  %v142_v44 = vrot.slane %v77_v27, 1 }
   0xa   :  { %236 = vst.msk [vmem:[%s543_s1] sm:$0xff] %vm235_vm1, %v205_v36  ;;  %239 = vst.msk [vmem:[%s543_s1 + $0x10] sm:$0xff] %vm235_vm1, %v207_v37  ;;  %v79_v45 = vmax.f32 %v279_v18, %v281_v28  ;;  %v80_v46 = vmax.f32 %v280_v26, %v282_v33  ;;  %v81_v47 = vmax.f32 %v281_v28, %v283_v34  ;;  %v293_v16 = vld [vmem:[%s542_s0 + $0xc0] sm:$0xff]  ;;  %v294_v21 = vld [vmem:[%s542_s0 + $0xc8] sm:$0xff] }
   0xb   :  { %242 = vst.msk [vmem:[%s543_s1 + $0x28] sm:$0x7f] %vm237_vm2, %v210_v39  ;;  %v82_v48 = vmax.f32 %v282_v33, %v284_v35  ;;  %v141_v50 = vsel %vm129_vm0, %v139_v25, %v140_v42  ;;  %v212_v51 = vmax.f32 %v76_v22, %v140_v42  ;;  %v143_v52 = vrot.slane %v78_v43, 1  ;;  %v295_v22 = vld [vmem:[%s542_s0 + $0xd0] sm:$0xff]  ;;  %v296_v31 = vld [vmem:[%s542_s0 + $0xd8] sm:$0xff]  ;;  %v297_v36 = vld [vmem:[%s542_s0 + $0xe0] sm:$0xff] }
   0xc   :  { %241 = vst.msk [vmem:[%s543_s1 + $0x20] sm:$0xff] %vm235_vm1, %v209_v41  ;;  %v83_v53 = vmax.f32 %v283_v34, %v285_v40  ;;  %v211_v54 = vmax.f32 %v75_v17, %v141_v50  ;;  %v145_v55 = vrot.slane %v79_v45, 1  ;;  %v146_v56 = vrot.slane %v80_v46, 1 }
   0xd   :  { %v148_v57 = vrot.slane %v81_v47, 1  ;;  %244 = vst.msk [vmem:[%s543_s1 + $0x38] sm:$0x7f] %vm237_vm2, %v212_v51  ;;  %v144_v58 = vsel %vm129_vm0, %v142_v44, %v143_v52  ;;  %v214_v59 = vmax.f32 %v78_v43, %v143_v52  ;;  %v149_v60 = vrot.slane %v82_v48, 1  ;;  %v300_v51 = vld [vmem:[%s542_s0 + $0xf8] sm:$0xff] }
   0xe   :  { %v84_v61 = vmax.f32 %v284_v35, %v286_v49  ;;  %243 = vst.msk [vmem:[%s543_s1 + $0x30] sm:$0xff] %vm235_vm1, %v211_v54  ;;  %v213_v1 = vmax.f32 %v77_v27, %v144_v58  ;;  %v147_v2 = vsel %vm129_vm0, %v145_v55, %v146_v56  ;;  %v216_v3 = vmax.f32 %v80_v46, %v146_v56  ;;  %v299_v46 = vld [vmem:[%s542_s0 + $0xf0] sm:$0xff] }
   0xf   :  { %v151_v4 = vrot.slane %v83_v53, 1  ;;  %246 = vst.msk [vmem:[%s543_s1 + $0x48] sm:$0x7f] %vm237_vm2, %v214_v59  ;;  %v215_v7 = vmax.f32 %v79_v45, %v147_v2  ;;  %v150_v8 = vsel %vm129_vm0, %v148_v57, %v149_v60  ;;  %v218_v9 = vmax.f32 %v82_v48, %v149_v60  ;;  %v298_v45 = vld [vmem:[%s542_s0 + $0xe8] sm:$0xff] }
  0x10   :  { %v152_v10 = vrot.slane %v84_v61, 1  ;;  %245 = vst.msk [vmem:[%s543_s1 + $0x40] sm:$0xff] %vm235_vm1, %v213_v1  ;;  %v217_v11 = vmax.f32 %v81_v47, %v150_v8  ;;  %v85_v12 = vmax.f32 %v285_v40, %v287_v62  ;;  %v86_v13 = vmax.f32 %v286_v49, %v288_v63 }
  0x11   :  { %248 = vst.msk [vmem:[%s543_s1 + $0x58] sm:$0x7f] %vm237_vm2, %v216_v3  ;;  %v87_v14 = vmax.f32 %v287_v62, %v289_v0  ;;  %250 = vst.msk [vmem:[%s543_s1 + $0x68] sm:$0x7f] %vm237_vm2, %v218_v9  ;;  %v88_v19 = vmax.f32 %v288_v63, %v290_v5  ;;  %v89_v20 = vmax.f32 %v289_v0, %v291_v6 }
  0x12   :  { %247 = vst.msk [vmem:[%s543_s1 + $0x50] sm:$0xff] %vm235_vm1, %v215_v7  ;;  %v153_v17 = vsel %vm129_vm0, %v151_v4, %v152_v10  ;;  %v220_v18 = vmax.f32 %v84_v61, %v152_v10  ;;  %249 = vst.msk [vmem:[%s543_s1 + $0x60] sm:$0xff] %vm235_vm1, %v217_v11  ;;  %v154_v24 = vrot.slane %v85_v12, 1  ;;  %v155_v25 = vrot.slane %v86_v13, 1 }
  0x13   :  { %v219_v23 = vmax.f32 %v83_v53, %v153_v17  ;;  %v157_v26 = vrot.slane %v87_v14, 1  ;;  %v158_v27 = vrot.slane %v88_v19, 1  ;;  %v90_v28 = vmax.f32 %v290_v5, %v292_v15 }
  0x14   :  { %252 = vst.msk [vmem:[%s543_s1 + $0x78] sm:$0x7f] %vm237_vm2, %v220_v18  ;;  %v160_v29 = vrot.slane %v89_v20, 1  ;;  %v91_v30 = vmax.f32 %v291_v6, %v293_v16  ;;  %v156_v32 = vsel %vm129_vm0, %v154_v24, %v155_v25  ;;  %v222_v33 = vmax.f32 %v86_v13, %v155_v25 }
  0x15   :  { %251 = vst.msk [vmem:[%s543_s1 + $0x70] sm:$0xff] %vm235_vm1, %v219_v23  ;;  %v92_v34 = vmax.f32 %v292_v15, %v294_v21  ;;  %v93_v35 = vmax.f32 %v293_v16, %v295_v22  ;;  %v221_v37 = vmax.f32 %v85_v12, %v156_v32  ;;  %v159_v38 = vsel %vm129_vm0, %v157_v26, %v158_v27 }
  0x16   :  { %v224_v39 = vmax.f32 %v88_v19, %v158_v27  ;;  %v161_v40 = vrot.slane %v90_v28, 1  ;;  %254 = vst.msk [vmem:[%s543_s1 + $0x88] sm:$0x7f] %vm237_vm2, %v222_v33  ;;  %v223_v41 = vmax.f32 %v87_v14, %v159_v38  ;;  %v163_v42 = vrot.slane %v91_v30, 1 }
  0x17   :  { %v164_v43 = vrot.slane %v92_v34, 1  ;;  %v94_v44 = vmax.f32 %v294_v21, %v296_v31  ;;  %253 = vst.msk [vmem:[%s543_s1 + $0x80] sm:$0xff] %vm235_vm1, %v221_v37  ;;  %v166_v49 = vrot.slane %v93_v35, 1  ;;  %v95_v50 = vmax.f32 %v295_v22, %v297_v36 }
  0x18   :  { %256 = vst.msk [vmem:[%s543_s1 + $0x98] sm:$0x7f] %vm237_vm2, %v224_v39  ;;  %v162_v47 = vsel %vm129_vm0, %v160_v29, %v161_v40  ;;  %v226_v48 = vmax.f32 %v90_v28, %v161_v40  ;;  %v96_v57 = vmax.f32 %v296_v31, %v298_v45  ;;  %v97_v59 = vmax.f32 %v297_v36, %v299_v46 }
  0x19   :  { %255 = vst.msk [vmem:[%s543_s1 + $0x90] sm:$0xff] %vm235_vm1, %v223_v41  ;;  %v225_v52 = vmax.f32 %v89_v20, %v162_v47  ;;  %v165_v53 = vsel %vm129_vm0, %v163_v42, %v164_v43  ;;  %v228_v54 = vmax.f32 %v92_v34, %v164_v43  ;;  %v167_v55 = vrot.slane %v94_v44, 1 }
  0x1a   :  { %258 = vst.msk [vmem:[%s543_s1 + $0xa8] sm:$0x7f] %vm237_vm2, %v226_v48  ;;  %v227_v56 = vmax.f32 %v91_v30, %v165_v53  ;;  %v169_v58 = vrot.slane %v95_v50, 1  ;;  %v98_v62 = vmax.f32 %v298_v45, %v300_v51  ;;  %v170_v0 = vrot.slane %v96_v57, 1 }
  0x1b   :  { %257 = vst.msk [vmem:[%s543_s1 + $0xa0] sm:$0xff] %vm235_vm1, %v225_v52  ;;  %v168_v60 = vsel %vm129_vm0, %v166_v49, %v167_v55  ;;  %v230_v61 = vmax.f32 %v94_v44, %v167_v55  ;;  %v172_v1 = vrot.slane %v97_v59, 1 }
  0x1c   :  { %260 = vst.msk [vmem:[%s543_s1 + $0xb8] sm:$0x7f] %vm237_vm2, %v228_v54  ;;  %v229_v63 = vmax.f32 %v93_v35, %v168_v60  ;;  %v173_v2 = vrot.slane %v98_v62, 1  ;;  %v171_v3 = vsel %vm129_vm0, %v169_v58, %v170_v0  ;;  %v232_v4 = vmax.f32 %v96_v57, %v170_v0 }
  0x1d   :  { %259 = vst.msk [vmem:[%s543_s1 + $0xb0] sm:$0xff] %vm235_vm1, %v227_v56  ;;  %v231_v5 = vmax.f32 %v95_v50, %v171_v3 }
  0x1e   :  { %262 = vst.msk [vmem:[%s543_s1 + $0xc8] sm:$0x7f] %vm237_vm2, %v230_v61  ;;  %v174_v6 = vsel %vm129_vm0, %v172_v1, %v173_v2  ;;  %v234_v7 = vmax.f32 %v98_v62, %v173_v2  ;;  %264 = vst.msk [vmem:[%s543_s1 + $0xd8] sm:$0x7f] %vm237_vm2, %v232_v4 }
  0x1f   :  { %261 = vst.msk [vmem:[%s543_s1 + $0xc0] sm:$0xff] %vm235_vm1, %v229_v63  ;;  %v233_v8 = vmax.f32 %v97_v59, %v174_v6  ;;  %263 = vst.msk [vmem:[%s543_s1 + $0xd0] sm:$0xff] %vm235_vm1, %v231_v5 }
  0x20   :  { %266 = vst.msk [vmem:[%s543_s1 + $0xe8] sm:$0x7f] %vm237_vm2, %v234_v7 }
  0x21   :  { %265 = vst.msk [vmem:[%s543_s1 + $0xe0] sm:$0xff] %vm235_vm1, %v233_v8 }

</bundles_post_ra>
